<compile_context>
chip_gen: v7x
topology: tpu7x:2x2x1
jax: 0.10.0
libtpu: 0.0.40
codegen_flags: <defaults>
</compile_context>

<pallas_src>
import jax
import jax.numpy as jnp
from jax.experimental import pallas as pl
from jax.experimental.pallas import tpu as pltpu

IN_DIM = 256
HID_DIM = 512
OUT_DIM = 28 * 28   # 784 output features (true width; no padding)


def _round_up(n: int, m: int) -> int:
    return ((n + m - 1) // m) * m


def mnist_generator_kernel(x_ref, w1_ref, b1_ref, w2_ref, b2_ref, o_ref):
    # Linear(256 -> 512) + ReLU.  bf16 operands, f32 MXU accumulation.
    x = x_ref[...]
    if x.dtype != jnp.bfloat16:          # static at trace time; no-op for bf16 inputs
        x = x.astype(jnp.bfloat16)
    h = jnp.dot(x, w1_ref[...], preferred_element_type=jnp.float32)
    h = jnp.maximum(h + b1_ref[...], 0.0)            # (TB, 512) + (1, 512)

    # Linear(512 -> 784) + Sigmoid.
    y = jnp.dot(h.astype(jnp.bfloat16), w2_ref[...],
                preferred_element_type=jnp.float32)
    y = y + b2_ref[...]                               # (TB, 784) + (1, 784)
    # sigmoid(y) = 0.5 * (1 + tanh(0.5 * y)): one EUP transcendental per
    # element (vs exp + reciprocal = two); scale/adds go to the VALU.
    o_ref[...] = (0.5 * jnp.tanh(0.5 * y) + 0.5).astype(o_ref.dtype)


def prepare_params(w1, b1, w2, b2):
    """f32 params in (in, out) layout -> kernel format.

    Weights are cast to bf16 (halves HBM traffic; MXU-native on v5e/v6e/v7x).
    Biases stay f32 (tiny, added into the f32 accumulator).
    """
    w1_bf = w1.astype(jnp.bfloat16)                       # (256, 512)
    w2_bf = w2.astype(jnp.bfloat16)                       # (512, 784)
    b1_k = b1.reshape(1, HID_DIM).astype(jnp.float32)     # (1, 512)
    b2_k = b2.reshape(1, OUT_DIM).astype(jnp.float32)     # (1, 784)
    return w1_bf, b1_k, w2_bf, b2_k


def mnist_generator_forward(x, w1_bf, b1, w2_bf, b2, *, tb=512):
    """x: (B, 256) bf16 (preferred; f32 accepted) -> (B, 784) bf16."""
    B = x.shape[0]
    TB = min(tb, _round_up(B, 8))        # batch tile (multiple of 8 sublanes)
    grid = (pl.cdiv(B, TB),)             # ragged last block handled by Pallas

    return pl.pallas_call(
        mnist_generator_kernel,
        out_shape=jax.ShapeDtypeStruct((B, OUT_DIM), jnp.bfloat16),
        grid=grid,
        in_specs=[
            pl.BlockSpec((TB, IN_DIM), lambda i: (i, 0)),         # x: batch-tiled
            pl.BlockSpec((IN_DIM, HID_DIM), lambda i: (0, 0)),    # w1: resident
            pl.BlockSpec((1, HID_DIM), lambda i: (0, 0)),         # b1: resident
            pl.BlockSpec((HID_DIM, OUT_DIM), lambda i: (0, 0)),   # w2: resident
            pl.BlockSpec((1, OUT_DIM), lambda i: (0, 0)),         # b2: resident
        ],
        out_specs=pl.BlockSpec((TB, OUT_DIM), lambda i: (i, 0)),
        compiler_params=pltpu.CompilerParams(
            dimension_semantics=("parallel",)),                   # megacore on v7x
    )(x, w1_bf, b1, w2_bf, b2)


def init_params(key):
    """Deterministic init mimicking torch.nn.Linear (uniform +/- 1/sqrt(fan_in)).

    Weights are returned in (in, out) layout (already transposed vs torch)."""
    k1, k2, k3, k4 = jax.random.split(key, 4)
    bound1 = 1.0 / jnp.sqrt(IN_DIM)
    bound2 = 1.0 / jnp.sqrt(HID_DIM)
    w1 = jax.random.uniform(k1, (IN_DIM, HID_DIM), jnp.float32, -bound1, bound1)
    b1 = jax.random.uniform(k2, (1, HID_DIM), jnp.float32, -bound1, bound1)
    w2 = jax.random.uniform(k3, (HID_DIM, OUT_DIM), jnp.float32, -bound2, bound2)
    b2 = jax.random.uniform(k4, (1, OUT_DIM), jnp.float32, -bound2, bound2)
    return w1, b1, w2, b2


if __name__ == "__main__":
    key = jax.random.PRNGKey(0)
    kx, kp = jax.random.split(key)

    B = 8  # small demo batch; wrapper tiles/handles any B without padding copies
    x = jax.random.normal(kx, (B, IN_DIM), jnp.float32).astype(jnp.bfloat16)
    w1, b1, w2, b2 = init_params(kp)
    w1_bf, b1_k, w2_bf, b2_k = prepare_params(w1, b1, w2, b2)

    out = mnist_generator_forward(x, w1_bf, b1_k, w2_bf, b2_k)
    out = jax.block_until_ready(out)

    # Reference in plain JAX with the same bf16 roundings the kernel applies.
    xf = x.astype(jnp.float32)
    w1f = w1_bf.astype(jnp.float32)
    w2f = w2_bf.astype(jnp.float32)
    h = jnp.maximum(xf @ w1f + b1_k, 0.0)
    hb = h.astype(jnp.bfloat16).astype(jnp.float32)
    yref = hb @ w2f + b2_k
    ref = jax.nn.sigmoid(yref)

    assert out.shape == (B, OUT_DIM)
    assert out.dtype == jnp.bfloat16
    # Tolerance covers bf16 output quantization (<~2e-3) + accumulation-order
    # differences; tanh-form sigmoid is exact in f32 up to rounding.
    err = float(jnp.max(jnp.abs(out.astype(jnp.float32) - ref)))
    assert err < 4e-3, err

    print("KERNEL_OK")
</pallas_src>

<mosaic_0001>
module attributes {stable_mosaic.version = 11 : i64} {
  func.func @mnist_generator_kernel(%arg0: i32, %arg1: memref<8x256xbf16, #tpu.memory_space<vmem>>, %arg2: memref<256x512xbf16, #tpu.memory_space<vmem>>, %arg3: memref<1x512xf32, #tpu.memory_space<vmem>>, %arg4: memref<512x784xbf16, #tpu.memory_space<vmem>>, %arg5: memref<1x784xf32, #tpu.memory_space<vmem>>, %arg6: memref<8x784xbf16, #tpu.memory_space<vmem>>) attributes {dimension_semantics = [#tpu.dimension_semantics<parallel>], iteration_bounds = array<i64: 1>, scalar_prefetch = 0 : i64, scratch_operands = 0 : i64, tpu.core_type = #tpu.core_type<tc>, window_params = [{transform_indices = @transform_0, window_bounds = array<i64: 8, 256>}, {pipeline_mode = #tpu.pipeline_mode<synchronous>, transform_indices = @transform_1, window_bounds = array<i64: 256, 512>}, {pipeline_mode = #tpu.pipeline_mode<synchronous>, transform_indices = @transform_2, window_bounds = array<i64: 1, 512>}, {pipeline_mode = #tpu.pipeline_mode<synchronous>, transform_indices = @transform_3, window_bounds = array<i64: 512, 784>}, {pipeline_mode = #tpu.pipeline_mode<synchronous>, transform_indices = @transform_4, window_bounds = array<i64: 1, 784>}, {transform_indices = @transform_5, window_bounds = array<i64: 8, 784>}]} {
    %c0 = arith.constant 0 : index
    %c0_0 = arith.constant 0 : index
    %0 = vector.load %arg1[%c0, %c0_0] : memref<8x256xbf16, #tpu.memory_space<vmem>>, vector<8x256xbf16>
    %c0_1 = arith.constant 0 : index
    %c0_2 = arith.constant 0 : index
    %1 = vector.load %arg2[%c0_1, %c0_2] : memref<256x512xbf16, #tpu.memory_space<vmem>>, vector<256x512xbf16>
    %cst = arith.constant dense<0.000000e+00> : vector<8x512xf32>
    %2 = tpu.matmul %0, %1, %cst {dimension_numbers = #tpu.dot_dimension_numbers<[1], [0], [0], [1], [0, 0, 1, 1], [], []>} : vector<8x256xbf16>, vector<256x512xbf16>, vector<8x512xf32> -> vector<8x512xf32>
    %c0_3 = arith.constant 0 : index
    %c0_4 = arith.constant 0 : index
    %3 = vector.load %arg3[%c0_3, %c0_4] : memref<1x512xf32, #tpu.memory_space<vmem>>, vector<1x512xf32>
    %4 = vector.broadcast %3 : vector<1x512xf32> to vector<8x512xf32>
    %5 = arith.addf %2, %4 : vector<8x512xf32>
    %cst_5 = arith.constant 0.000000e+00 : f32
    %6 = vector.broadcast %cst_5 : f32 to vector<8x512xf32>
    %7 = arith.maximumf %5, %6 : vector<8x512xf32>
    %8 = arith.truncf %7 : vector<8x512xf32> to vector<8x512xbf16>
    %c0_6 = arith.constant 0 : index
    %c0_7 = arith.constant 0 : index
    %9 = vector.load %arg4[%c0_6, %c0_7] : memref<512x784xbf16, #tpu.memory_space<vmem>>, vector<512x784xbf16>
    %cst_8 = arith.constant dense<0.000000e+00> : vector<8x784xf32>
    %10 = tpu.matmul %8, %9, %cst_8 {dimension_numbers = #tpu.dot_dimension_numbers<[1], [0], [0], [1], [0, 0, 1, 1], [], []>} : vector<8x512xbf16>, vector<512x784xbf16>, vector<8x784xf32> -> vector<8x784xf32>
    %c0_9 = arith.constant 0 : index
    %c0_10 = arith.constant 0 : index
    %11 = vector.load %arg5[%c0_9, %c0_10] : memref<1x784xf32, #tpu.memory_space<vmem>>, vector<1x784xf32>
    %12 = vector.broadcast %11 : vector<1x784xf32> to vector<8x784xf32>
    %13 = arith.addf %10, %12 : vector<8x784xf32>
    %cst_11 = arith.constant 5.000000e-01 : f32
    %14 = vector.broadcast %cst_11 : f32 to vector<8x784xf32>
    %15 = arith.mulf %14, %13 : vector<8x784xf32>
    %16 = math.tanh %15 : vector<8x784xf32>
    %cst_12 = arith.constant 5.000000e-01 : f32
    %17 = vector.broadcast %cst_12 : f32 to vector<8x784xf32>
    %18 = arith.mulf %17, %16 : vector<8x784xf32>
    %cst_13 = arith.constant 5.000000e-01 : f32
    %19 = vector.broadcast %cst_13 : f32 to vector<8x784xf32>
    %20 = arith.addf %18, %19 : vector<8x784xf32>
    %21 = arith.truncf %20 : vector<8x784xf32> to vector<8x784xbf16>
    %c0_14 = arith.constant 0 : index
    %c0_15 = arith.constant 0 : index
    %22 = vector.load %arg6[%c0_14, %c0_15] : memref<8x784xbf16, #tpu.memory_space<vmem>>, vector<8x784xbf16>
    tpu.vector_store %arg6[%c0_14, %c0_15], %21 {strides = array<i32>} : memref<8x784xbf16, #tpu.memory_space<vmem>>, vector<8x784xbf16>,
    return
  }
  func.func @transform_0(%arg0: i32) -> (i32, i32) {
    %c0_i32 = arith.constant 0 : i32
    %c0_i32_0 = arith.constant 0 : i32
    return %arg0, %c0_i32 : i32, i32
  }
  func.func @transform_1(%arg0: i32) -> (i32, i32) {
    %c0_i32 = arith.constant 0 : i32
    %c0_i32_0 = arith.constant 0 : i32
    %c0_i32_1 = arith.constant 0 : i32
    return %c0_i32, %c0_i32_0 : i32, i32
  }
  func.func @transform_2(%arg0: i32) -> (i32, i32) {
    %c0_i32 = arith.constant 0 : i32
    %c0_i32_0 = arith.constant 0 : i32
    %c0_i32_1 = arith.constant 0 : i32
    return %c0_i32, %c0_i32_0 : i32, i32
  }
  func.func @transform_3(%arg0: i32) -> (i32, i32) {
    %c0_i32 = arith.constant 0 : i32
    %c0_i32_0 = arith.constant 0 : i32
    %c0_i32_1 = arith.constant 0 : i32
    return %c0_i32, %c0_i32_0 : i32, i32
  }
  func.func @transform_4(%arg0: i32) -> (i32, i32) {
    %c0_i32 = arith.constant 0 : i32
    %c0_i32_0 = arith.constant 0 : i32
    %c0_i32_1 = arith.constant 0 : i32
    return %c0_i32, %c0_i32_0 : i32, i32
  }
  func.func @transform_5(%arg0: i32) -> (i32, i32) {
    %c0_i32 = arith.constant 0 : i32
    %c0_i32_0 = arith.constant 0 : i32
    return %arg0, %c0_i32 : i32, i32
  }
}

</mosaic_0001>

<bundles_post_ra>
// kernel: tpu_custom_call.1
= control target key start
LH: loop header
LB: loop body
LE: loop exit
PB: predicated region body
PF: predicated region fallthrough
CT: control target
= control target key end

     0   :  { %s4179_s0 = inlined_call_operand.vmem [shape: bf16[8,256], index: 0, kind: input, shape index: {}]   ;;  %s4180_s1 = inlined_call_operand.vmem [shape: bf16[256,512], index: 1, kind: input, shape index: {}]   ;;  %s4181_s2 = inlined_call_operand.vmem [shape: f32[1,512], index: 2, kind: input, shape index: {}]   ;;  %s4182_s3 = inlined_call_operand.vmem [shape: bf16[512,784], index: 3, kind: input, shape index: {}]   ;;  %s4183_s4 = inlined_call_operand.vmem [shape: f32[1,784], index: 4, kind: input, shape index: {}]   ;;  %s4184_s5 = inlined_call_operand.hbm [shape: bf16[8,784], index: 5, kind: output, shape index: {}]  }
   0x1   :  { %v2734_v0 = vld [vmem:[%s4180_s1 + $0x4] ss:$16 sps:$4 sm:$0xff]   ;;  %v2736_v1 = vld [vmem:[%s4180_s1] ss:$16 sps:$4 sm:$0xff]   ;;  %v2782_v14 = vld [vmem:[%s4180_s1 + $0xc] ss:$16 sps:$4 sm:$0xff]  }
   0x2   :  { %436 = vmatprep.subr.bf16.mxu0 %v2734_v0  ;;  %v2737_v2 = vld [vmem:[%s4180_s1 + $0x24] ss:$16 sps:$4 sm:$0xff]   ;;  %v2739_v3 = vld [vmem:[%s4180_s1 + $0x20] ss:$16 sps:$4 sm:$0xff]   ;;  %v2784_v15 = vld [vmem:[%s4180_s1 + $0x8] ss:$16 sps:$4 sm:$0xff]   ;;  %477 = vmatprep.subr.bf16.mxu1 %v2782_v14 }
   0x3   :  { %437 = vmatpush1.bf16.msra.mxu0 %v2736_v1  ;;  %v2740_v4 = vld [vmem:[%s4180_s1 + $0x44] ss:$16 sps:$4 sm:$0xff]   ;;  %v2742_v5 = vld [vmem:[%s4180_s1 + $0x40] ss:$16 sps:$4 sm:$0xff]   ;;  %v2787_v18 = vld [vmem:[%s4180_s1 + $0x2c] ss:$16 sps:$4 sm:$0xff]   ;;  %478 = vmatpush1.bf16.msra.mxu1 %v2784_v15 }
   0x4   :  { %438 = vmatprep.subr.bf16.mxu0 %v2737_v2  ;;  %v2743_v6 = vld [vmem:[%s4180_s1 + $0x64] ss:$16 sps:$4 sm:$0xff]   ;;  %v2745_v7 = vld [vmem:[%s4180_s1 + $0x60] ss:$16 sps:$4 sm:$0xff]   ;;  %v2789_v20 = vld [vmem:[%s4180_s1 + $0x28] ss:$16 sps:$4 sm:$0xff]   ;;  %479 = vmatprep.subr.bf16.mxu1 %v2787_v18 }
   0x5   :  { %v2746_v8 = vld [vmem:[%s4180_s1 + $0x84] ss:$16 sps:$4 sm:$0xff]   ;;  %v2748_v9 = vld [vmem:[%s4180_s1 + $0x80] ss:$16 sps:$4 sm:$0xff]   ;;  %v2790_v21 = vld [vmem:[%s4180_s1 + $0x4c] ss:$16 sps:$4 sm:$0xff]  }
   0x6   :  { %v2749_v10 = vld [vmem:[%s4180_s1 + $0xa4] ss:$16 sps:$4 sm:$0xff]   ;;  %v2751_v11 = vld [vmem:[%s4180_s1 + $0xa0] ss:$16 sps:$4 sm:$0xff]   ;;  %v2792_v24 = vld [vmem:[%s4180_s1 + $0x48] ss:$16 sps:$4 sm:$0xff]  }
   0x7   :  { %439 = vmatpush1.bf16.msra.mxu0 %v2739_v3  ;;  %v2752_v12 = vld [vmem:[%s4180_s1 + $0xc4] ss:$16 sps:$4 sm:$0xff]   ;;  %v2754_v13 = vld [vmem:[%s4180_s1 + $0xc0] ss:$16 sps:$4 sm:$0xff]   ;;  %480 = vmatpush1.bf16.msra.mxu1 %v2789_v20  ;;  %v2793_v25 = vld [vmem:[%s4180_s1 + $0x6c] ss:$16 sps:$4 sm:$0xff]  }
   0x8   :  { %440 = vmatprep.subr.bf16.mxu0 %v2740_v4  ;;  %v3272_v16 = vld [vmem:[%s4179_s0] sm:$0xff]  ;;  %481 = vmatprep.subr.bf16.mxu1 %v2790_v21  ;;  %v2795_v28 = vld [vmem:[%s4180_s1 + $0x68] ss:$16 sps:$4 sm:$0xff]   ;;  %v2796_v29 = vld [vmem:[%s4180_s1 + $0x8c] ss:$16 sps:$4 sm:$0xff]  }
   0x9   :  { %v2374_v17 = vcombine.high %v3272_v16, %v3272_v16  ;;  %v2755_v19 = vld [vmem:[%s4180_s1 + $0xe4] ss:$16 sps:$4 sm:$0xff]   ;;  %v2757_v22 = vld [vmem:[%s4180_s1 + $0xe0] ss:$16 sps:$4 sm:$0xff]   ;;  %v2798_v32 = vld [vmem:[%s4180_s1 + $0x88] ss:$16 sps:$4 sm:$0xff]   ;;  %v2373_v57 = vcombine.low %v3272_v16, %v3272_v16 }
   0xa   :  { %v2758_v23 = vld [vmem:[%s4180_s1 + $0x104] ss:$16 sps:$4 sm:$0xff]   ;;  %v2760_v26 = vld [vmem:[%s4180_s1 + $0x100] ss:$16 sps:$4 sm:$0xff]   ;;  %v2799_v33 = vld [vmem:[%s4180_s1 + $0xac] ss:$16 sps:$4 sm:$0xff]  }
   0xb   :  { %441 = vmatpush1.bf16.msra.mxu0 %v2742_v5  ;;  %468 = vmatprep.mubr.bf16.mxu0 %v2374_v17  ;;  %v2761_v27 = vld [vmem:[%s4180_s1 + $0x124] ss:$16 sps:$4 sm:$0xff]   ;;  %v2763_v30 = vld [vmem:[%s4180_s1 + $0x120] ss:$16 sps:$4 sm:$0xff]   ;;  %v2801_v36 = vld [vmem:[%s4180_s1 + $0xa8] ss:$16 sps:$4 sm:$0xff]  }
   0xc   :  { %442 = vmatprep.subr.bf16.mxu0 %v2743_v6  ;;  %509 = vmatprep.mubr.bf16.mxu1 %v2374_v17  ;;  %v2764_v31 = vld [vmem:[%s4180_s1 + $0x144] ss:$16 sps:$4 sm:$0xff]   ;;  %v2766_v34 = vld [vmem:[%s4180_s1 + $0x140] ss:$16 sps:$4 sm:$0xff]   ;;  %v2802_v37 = vld [vmem:[%s4180_s1 + $0xcc] ss:$16 sps:$4 sm:$0xff]  }
   0xd   :  { %482 = vmatpush1.bf16.msra.mxu1 %v2792_v24  ;;  %v2767_v35 = vld [vmem:[%s4180_s1 + $0x164] ss:$16 sps:$4 sm:$0xff]   ;;  %v2769_v38 = vld [vmem:[%s4180_s1 + $0x160] ss:$16 sps:$4 sm:$0xff]   ;;  %v2804_v40 = vld [vmem:[%s4180_s1 + $0xc8] ss:$16 sps:$4 sm:$0xff]  }
   0xe   :  { %483 = vmatprep.subr.bf16.mxu1 %v2793_v25  ;;  %v2770_v39 = vld [vmem:[%s4180_s1 + $0x184] ss:$16 sps:$4 sm:$0xff]   ;;  %v2805_v41 = vld [vmem:[%s4180_s1 + $0xec] ss:$16 sps:$4 sm:$0xff]   ;;  %v2772_v42 = vld [vmem:[%s4180_s1 + $0x180] ss:$16 sps:$4 sm:$0xff]  }
   0xf   :  { %443 = vmatpush1.bf16.msra.mxu0 %v2745_v7  ;;  %v2773_v43 = vld [vmem:[%s4180_s1 + $0x1a4] ss:$16 sps:$4 sm:$0xff]   ;;  %v2807_v44 = vld [vmem:[%s4180_s1 + $0xe8] ss:$16 sps:$4 sm:$0xff]   ;;  %v2808_v45 = vld [vmem:[%s4180_s1 + $0x10c] ss:$16 sps:$4 sm:$0xff]  }
  0x10   :  { %444 = vmatprep.subr.bf16.mxu0 %v2746_v8  ;;  %v2775_v46 = vld [vmem:[%s4180_s1 + $0x1a0] ss:$16 sps:$4 sm:$0xff]   ;;  %v2776_v47 = vld [vmem:[%s4180_s1 + $0x1c4] ss:$16 sps:$4 sm:$0xff]   ;;  %v2810_v48 = vld [vmem:[%s4180_s1 + $0x108] ss:$16 sps:$4 sm:$0xff]  }
  0x11   :  { %484 = vmatpush1.bf16.msra.mxu1 %v2795_v28  ;;  %v2811_v49 = vld [vmem:[%s4180_s1 + $0x12c] ss:$16 sps:$4 sm:$0xff]   ;;  %v2778_v50 = vld [vmem:[%s4180_s1 + $0x1c0] ss:$16 sps:$4 sm:$0xff]   ;;  %v2779_v51 = vld [vmem:[%s4180_s1 + $0x1e4] ss:$16 sps:$4 sm:$0xff]  }
  0x12   :  { %485 = vmatprep.subr.bf16.mxu1 %v2796_v29  ;;  %v2813_v52 = vld [vmem:[%s4180_s1 + $0x128] ss:$16 sps:$4 sm:$0xff]   ;;  %v2814_v53 = vld [vmem:[%s4180_s1 + $0x14c] ss:$16 sps:$4 sm:$0xff]   ;;  %v2781_v54 = vld [vmem:[%s4180_s1 + $0x1e0] ss:$16 sps:$4 sm:$0xff]  }
  0x13   :  { %445 = vmatpush1.bf16.msra.mxu0 %v2748_v9  ;;  %v2834_v55 = vld [vmem:[%s4182_s3 + $0x4] ss:$28 sps:$4 sm:$0xff]   ;;  %v2816_v56 = vld [vmem:[%s4180_s1 + $0x148] ss:$16 sps:$4 sm:$0xff]   ;;  %v2817_v58 = vld [vmem:[%s4180_s1 + $0x16c] ss:$16 sps:$4 sm:$0xff]  }
  0x14   :  { %446 = vmatprep.subr.bf16.mxu0 %v2749_v10  ;;  %v2832_v59 = vld [vmem:[%s4182_s3] ss:$28 sps:$4 sm:$0xff]   ;;  %v2819_v61 = vld [vmem:[%s4180_s1 + $0x168] ss:$16 sps:$4 sm:$0xff]   ;;  %v2846_v0 = vld [vmem:[%s4182_s3 + $0x74] ss:$28 sps:$4 sm:$0xff]  }
  0x15   :  { %486 = vmatpush1.bf16.msra.mxu1 %v2798_v32  ;;  %v2840_v60 = vld [vmem:[%s4182_s3 + $0x3c] ss:$28 sps:$4 sm:$0xff]   ;;  %v2844_v3 = vld [vmem:[%s4182_s3 + $0x70] ss:$28 sps:$4 sm:$0xff]   ;;  %v2850_v7 = vld [vmem:[%s4182_s3 + $0xa8] ss:$28 sps:$4 sm:$0xff]  }
  0x16   :  { %487 = vmatprep.subr.bf16.mxu1 %v2799_v33  ;;  %v2820_v62 = vld [vmem:[%s4180_s1 + $0x18c] ss:$16 sps:$4 sm:$0xff]   ;;  %v2838_v63 = vld [vmem:[%s4182_s3 + $0x38] ss:$28 sps:$4 sm:$0xff]   ;;  %v2858_v8 = vld [vmem:[%s4182_s3 + $0xe4] ss:$28 sps:$4 sm:$0xff]  }
  0x17   :  { %447 = vmatpush1.bf16.msra.mxu0 %v2751_v11  ;;  %v2822_v1 = vld [vmem:[%s4180_s1 + $0x188] ss:$16 sps:$4 sm:$0xff]   ;;  %v2823_v2 = vld [vmem:[%s4180_s1 + $0x1ac] ss:$16 sps:$4 sm:$0xff]   ;;  %v2870_v16 = vld [vmem:[%s4182_s3 + $0x154] ss:$28 sps:$4 sm:$0xff]  }
  0x18   :  { %448 = vmatprep.subr.bf16.mxu0 %v2752_v12  ;;  %v2852_v4 = vld [vmem:[%s4182_s3 + $0xac] ss:$28 sps:$4 sm:$0xff]   ;;  %v2856_v12 = vld [vmem:[%s4182_s3 + $0xe0] ss:$28 sps:$4 sm:$0xff]   ;;  %v2862_v15 = vld [vmem:[%s4182_s3 + $0x118] ss:$28 sps:$4 sm:$0xff]  }
  0x19   :  { %488 = vmatpush1.bf16.msra.mxu1 %v2801_v36  ;;  %v2825_v5 = vld [vmem:[%s4180_s1 + $0x1a8] ss:$16 sps:$4 sm:$0xff]   ;;  %v2826_v6 = vld [vmem:[%s4180_s1 + $0x1cc] ss:$16 sps:$4 sm:$0xff]   ;;  %v2843_v18 = vld [vmem:[%s4182_s3 + $0x44] ss:$28 sps:$4 sm:$0xff]  }
  0x1a   :  { %489 = vmatprep.subr.bf16.mxu1 %v2802_v37  ;;  %v2828_v9 = vld [vmem:[%s4180_s1 + $0x1c8] ss:$16 sps:$4 sm:$0xff]   ;;  %v2829_v10 = vld [vmem:[%s4180_s1 + $0x1ec] ss:$16 sps:$4 sm:$0xff]   ;;  %v2882_v24 = vld [vmem:[%s4182_s3 + $0x1c4] ss:$28 sps:$4 sm:$0xff]  }
  0x1b   :  { %449 = vmatpush1.bf16.msra.mxu0 %v2754_v13  ;;  %v2831_v11 = vld [vmem:[%s4180_s1 + $0x1e8] ss:$16 sps:$4 sm:$0xff]   ;;  %v2841_v21 = vld [vmem:[%s4182_s3 + $0x40] ss:$28 sps:$4 sm:$0xff]   ;;  %v2853_v29 = vld [vmem:[%s4182_s3 + $0xb0] ss:$28 sps:$4 sm:$0xff]  }
  0x1c   :  { %450 = vmatprep.subr.bf16.mxu0 %v2755_v19  ;;  %v2837_v13 = vld [vmem:[%s4182_s3 + $0xc] ss:$28 sps:$4 sm:$0xff]   ;;  %v2864_v14 = vld [vmem:[%s4182_s3 + $0x11c] ss:$28 sps:$4 sm:$0xff]   ;;  %v2894_v32 = vld [vmem:[%s4182_s3 + $0x234] ss:$28 sps:$4 sm:$0xff]  }
  0x1d   :  { %490 = vmatpush1.bf16.msra.mxu1 %v2804_v40  ;;  %v2835_v17 = vld [vmem:[%s4182_s3 + $0x8] ss:$28 sps:$4 sm:$0xff]   ;;  %v2868_v19 = vld [vmem:[%s4182_s3 + $0x150] ss:$28 sps:$4 sm:$0xff]   ;;  %v2847_v25 = vld [vmem:[%s4182_s3 + $0x78] ss:$28 sps:$4 sm:$0xff]  }
  0x1e   :  { %491 = vmatprep.subr.bf16.mxu1 %v2805_v41  ;;  %v2876_v20 = vld [vmem:[%s4182_s3 + $0x18c] ss:$28 sps:$4 sm:$0xff]   ;;  %v2888_v28 = vld [vmem:[%s4182_s3 + $0x1fc] ss:$28 sps:$4 sm:$0xff]   ;;  %v2906_v40 = vld [vmem:[%s4182_s3 + $0x2a4] ss:$28 sps:$4 sm:$0xff]  }
  0x1f   :  { %451 = vmatpush1.bf16.msra.mxu0 %v2757_v22  ;;  %v2849_v22 = vld [vmem:[%s4182_s3 + $0x7c] ss:$28 sps:$4 sm:$0xff]   ;;  %v2859_v33 = vld [vmem:[%s4182_s3 + $0xe8] ss:$28 sps:$4 sm:$0xff]  }
  0x20   :  { %452 = vmatprep.subr.bf16.mxu0 %v2758_v23  ;;  %v2874_v23 = vld [vmem:[%s4182_s3 + $0x188] ss:$28 sps:$4 sm:$0xff]   ;;  %v2865_v37 = vld [vmem:[%s4182_s3 + $0x120] ss:$28 sps:$4 sm:$0xff]   ;;  %v2871_v41 = vld [vmem:[%s4182_s3 + $0x158] ss:$28 sps:$4 sm:$0xff]  }
  0x21   :  { %492 = vmatpush1.bf16.msra.mxu1 %v2807_v44  ;;  %v2900_v36 = vld [vmem:[%s4182_s3 + $0x26c] ss:$28 sps:$4 sm:$0xff]   ;;  %v2912_v44 = vld [vmem:[%s4182_s3 + $0x2dc] ss:$28 sps:$4 sm:$0xff]  }
  0x22   :  { %493 = vmatprep.subr.bf16.mxu1 %v2808_v45  ;;  %v2877_v45 = vld [vmem:[%s4182_s3 + $0x190] ss:$28 sps:$4 sm:$0xff]  }
  0x23   :  { %453 = vmatpush1.bf16.msra.mxu0 %v2760_v26  ;;  %v2855_v26 = vld [vmem:[%s4182_s3 + $0xb4] ss:$28 sps:$4 sm:$0xff]  }
  0x24   :  { %454 = vmatprep.subr.bf16.mxu0 %v2761_v27  ;;  %v2880_v27 = vld [vmem:[%s4182_s3 + $0x1c0] ss:$28 sps:$4 sm:$0xff]  }
  0x25   :  { %494 = vmatpush1.bf16.msra.mxu1 %v2810_v48  ;;  %v2883_v48 = vld [vmem:[%s4182_s3 + $0x1c8] ss:$28 sps:$4 sm:$0xff]  }
  0x26   :  { %495 = vmatprep.subr.bf16.mxu1 %v2811_v49  ;;  %v2891_v49 = vld [vmem:[%s4182_s3 + $0x204] ss:$28 sps:$4 sm:$0xff]  }
  0x27   :  { %455 = vmatpush1.bf16.msra.mxu0 %v2763_v30  ;;  %v2861_v30 = vld [vmem:[%s4182_s3 + $0xec] ss:$28 sps:$4 sm:$0xff]  }
  0x28   :  { %456 = vmatprep.subr.bf16.mxu0 %v2764_v31  ;;  %v2886_v31 = vld [vmem:[%s4182_s3 + $0x1f8] ss:$28 sps:$4 sm:$0xff]  }
  0x29   :  { %496 = vmatpush1.bf16.msra.mxu1 %v2813_v52  ;;  %v2895_v52 = vld [vmem:[%s4182_s3 + $0x238] ss:$28 sps:$4 sm:$0xff]  }
  0x2a   :  { %497 = vmatprep.subr.bf16.mxu1 %v2814_v53  ;;  %v2903_v53 = vld [vmem:[%s4182_s3 + $0x274] ss:$28 sps:$4 sm:$0xff]  }
  0x2b   :  { %457 = vmatpush1.bf16.msra.mxu0 %v2766_v34  ;;  %v2867_v34 = vld [vmem:[%s4182_s3 + $0x124] ss:$28 sps:$4 sm:$0xff]  }
  0x2c   :  { %458 = vmatprep.subr.bf16.mxu0 %v2767_v35  ;;  %v2892_v35 = vld [vmem:[%s4182_s3 + $0x230] ss:$28 sps:$4 sm:$0xff]  }
  0x2d   :  { %498 = vmatpush1.bf16.msra.mxu1 %v2816_v56  ;;  %v2907_v56 = vld [vmem:[%s4182_s3 + $0x2a8] ss:$28 sps:$4 sm:$0xff]  }
  0x2e   :  { %499 = vmatprep.subr.bf16.mxu1 %v2817_v58  ;;  %v2913_v58 = vld [vmem:[%s4182_s3 + $0x2e0] ss:$28 sps:$4 sm:$0xff]  }
  0x2f   :  { %459 = vmatpush1.bf16.msra.mxu0 %v2769_v38  ;;  %v2873_v38 = vld [vmem:[%s4182_s3 + $0x15c] ss:$28 sps:$4 sm:$0xff]  }
  0x30   :  { %460 = vmatprep.subr.bf16.mxu0 %v2770_v39  ;;  %v2898_v39 = vld [vmem:[%s4182_s3 + $0x268] ss:$28 sps:$4 sm:$0xff]  }
  0x31   :  { %500 = vmatpush1.bf16.msra.mxu1 %v2819_v61  ;;  %v2916_v61 = vld [vmem:[%s4182_s3 + $0x310] ss:$28 sps:$4 sm:$0xff]  }
  0x32   :  { %501 = vmatprep.subr.bf16.mxu1 %v2820_v62  ;;  %v2919_v62 = vld [vmem:[%s4182_s3 + $0x318] ss:$28 sps:$4 sm:$0xff]  }
  0x33   :  { %461 = vmatpush1.bf16.msra.mxu0 %v2772_v42  ;;  %v2879_v42 = vld [vmem:[%s4182_s3 + $0x194] ss:$28 sps:$4 sm:$0xff]  }
  0x34   :  { %462 = vmatprep.subr.bf16.mxu0 %v2773_v43  ;;  %v2904_v43 = vld [vmem:[%s4182_s3 + $0x2a0] ss:$28 sps:$4 sm:$0xff]  }
  0x35   :  { %502 = vmatpush1.bf16.msra.mxu1 %v2822_v1 }
  0x36   :  { %503 = vmatprep.subr.bf16.mxu1 %v2823_v2 }
  0x37   :  { %463 = vmatpush1.bf16.msra.mxu0 %v2775_v46  ;;  %v2885_v46 = vld [vmem:[%s4182_s3 + $0x1cc] ss:$28 sps:$4 sm:$0xff]  }
  0x38   :  { %464 = vmatprep.subr.bf16.mxu0 %v2776_v47  ;;  %v2910_v47 = vld [vmem:[%s4182_s3 + $0x2d8] ss:$28 sps:$4 sm:$0xff]  }
  0x39   :  { %504 = vmatpush1.bf16.msra.mxu1 %v2825_v5 }
  0x3a   :  { %505 = vmatprep.subr.bf16.mxu1 %v2826_v6 }
  0x3b   :  { %465 = vmatpush1.bf16.msra.mxu0 %v2778_v50  ;;  %v2889_v50 = vld [vmem:[%s4182_s3 + $0x200] ss:$28 sps:$4 sm:$0xff]  }
  0x3c   :  { %466 = vmatprep.subr.bf16.mxu0 %v2779_v51  ;;  %v2897_v51 = vld [vmem:[%s4182_s3 + $0x23c] ss:$28 sps:$4 sm:$0xff]  }
  0x3d   :  { %506 = vmatpush1.bf16.msra.mxu1 %v2828_v9 }
  0x3e   :  { %507 = vmatprep.subr.bf16.mxu1 %v2829_v10 }
  0x3f   :  { %467 = vmatpush1.bf16.msra.mxu0 %v2781_v54  ;;  %v2901_v54 = vld [vmem:[%s4182_s3 + $0x270] ss:$28 sps:$4 sm:$0xff]  }
  0x40   :  { %1971 = vmatprep.subr.bf16.mxu0 %v2834_v55  ;;  %v2909_v55 = vld [vmem:[%s4182_s3 + $0x2ac] ss:$28 sps:$4 sm:$0xff]  }
  0x41   :  { %508 = vmatpush1.bf16.msra.mxu1 %v2831_v11 }
  0x42   :  { %469 = vmatmul.mubr.bf16.vlgmr.msra.gmra.mrb[0].mxu0 %v2373_v57  ;;  %2053 = vmatprep.subr.bf16.mxu1 %v2837_v13 }
  0x43   :  { %1972 = vmatpush1.bf16.msra.mxu0 %v2832_v59  ;;  %v2918_v59 = vld [vmem:[%s4182_s3 + $0x314] ss:$28 sps:$4 sm:$0xff]  }
  0x44   :  { %1973 = vmatprep.subr.bf16.mxu0 %v2840_v60  ;;  %510 = vmatmul.mubr.bf16.vlgmr.msra.gmra.mrb[0].mxu1 %v2373_v57  ;;  %v2915_v57 = vld [vmem:[%s4182_s3 + $0x2e4] ss:$28 sps:$4 sm:$0xff]   ;;  %v2921_v60 = vld [vmem:[%s4182_s3 + $0x31c] ss:$28 sps:$4 sm:$0xff]  }
  0x45   :  { %2054 = vmatpush1.bf16.msra.mxu1 %v2835_v17 }
  0x46   :  { %2055 = vmatprep.subr.bf16.mxu1 %v2843_v18 }
  0x47   :  { %1974 = vmatpush1.bf16.msra.mxu0 %v2838_v63 }
  0x48   :  { %1975 = vmatprep.subr.bf16.mxu0 %v2846_v0 }
  0x49   :  { %2056 = vmatpush1.bf16.msra.mxu1 %v2841_v21 }
  0x4a   :  { %2057 = vmatprep.subr.bf16.mxu1 %v2849_v22 }
  0x4b   :  { %1976 = vmatpush1.bf16.msra.mxu0 %v2844_v3 }
  0x4c   :  { %1977 = vmatprep.subr.bf16.mxu0 %v2852_v4 }
  0x4d   :  { %2058 = vmatpush1.bf16.msra.mxu1 %v2847_v25 }
  0x4e   :  { %2059 = vmatprep.subr.bf16.mxu1 %v2855_v26 }
  0x4f   :  { %1978 = vmatpush1.bf16.msra.mxu0 %v2850_v7 }
  0x50   :  { %1979 = vmatprep.subr.bf16.mxu0 %v2858_v8 }
  0x51   :  { %2060 = vmatpush1.bf16.msra.mxu1 %v2853_v29 }
  0x52   :  { %2061 = vmatprep.subr.bf16.mxu1 %v2861_v30 }
  0x53   :  { %1980 = vmatpush1.bf16.msra.mxu0 %v2856_v12 }
  0x54   :  { %1981 = vmatprep.subr.bf16.mxu0 %v2864_v14 }
  0x55   :  { %2062 = vmatpush1.bf16.msra.mxu1 %v2859_v33 }
  0x56   :  { %2063 = vmatprep.subr.bf16.mxu1 %v2867_v34 }
  0x57   :  { %1982 = vmatpush1.bf16.msra.mxu0 %v2862_v15 }
  0x58   :  { %1983 = vmatprep.subr.bf16.mxu0 %v2870_v16 }
  0x59   :  { %2064 = vmatpush1.bf16.msra.mxu1 %v2865_v37 }
  0x5a   :  { %2065 = vmatprep.subr.bf16.mxu1 %v2873_v38 }
  0x5b   :  { %1984 = vmatpush1.bf16.msra.mxu0 %v2868_v19 }
  0x5c   :  { %1985 = vmatprep.subr.bf16.mxu0 %v2876_v20 }
  0x5d   :  { %2066 = vmatpush1.bf16.msra.mxu1 %v2871_v41 }
  0x5e   :  { %2067 = vmatprep.subr.bf16.mxu1 %v2879_v42 }
  0x5f   :  { %1986 = vmatpush1.bf16.msra.mxu0 %v2874_v23 }
  0x60   :  { %1987 = vmatprep.subr.bf16.mxu0 %v2882_v24 }
  0x61   :  { %2068 = vmatpush1.bf16.msra.mxu1 %v2877_v45 }
  0x62   :  { %2069 = vmatprep.subr.bf16.mxu1 %v2885_v46 }
  0x63   :  { %1988 = vmatpush1.bf16.msra.mxu0 %v2880_v27 }
  0x64   :  { %1989 = vmatprep.subr.bf16.mxu0 %v2888_v28 }
  0x65   :  { %2070 = vmatpush1.bf16.msra.mxu1 %v2883_v48 }
  0x66   :  { %2071 = vmatprep.subr.bf16.mxu1 %v2891_v49 }
  0x67   :  { %1990 = vmatpush1.bf16.msra.mxu0 %v2886_v31 }
  0x68   :  { %1991 = vmatprep.subr.bf16.mxu0 %v2894_v32 }
  0x69   :  { %2072 = vmatpush1.bf16.msra.mxu1 %v2889_v50 }
  0x6a   :  { %2073 = vmatprep.subr.bf16.mxu1 %v2897_v51 }
  0x6b   :  { %1992 = vmatpush1.bf16.msra.mxu0 %v2892_v35 }
  0x6c   :  { %1993 = vmatprep.subr.bf16.mxu0 %v2900_v36 }
  0x6d   :  { %2074 = vmatpush1.bf16.msra.mxu1 %v2895_v52 }
  0x6e   :  { %2075 = vmatprep.subr.bf16.mxu1 %v2903_v53 }
  0x6f   :  { %1994 = vmatpush1.bf16.msra.mxu0 %v2898_v39 }
  0x70   :  { %1995 = vmatprep.subr.bf16.mxu0 %v2906_v40 }
  0x71   :  { %2076 = vmatpush1.bf16.msra.mxu1 %v2901_v54 }
  0x72   :  { %2077 = vmatprep.subr.bf16.mxu1 %v2909_v55 }
  0x73   :  { %1996 = vmatpush1.bf16.msra.mxu0 %v2904_v43 }
  0x74   :  { %1997 = vmatprep.subr.bf16.mxu0 %v2912_v44 }
  0x75   :  { %2078 = vmatpush1.bf16.msra.mxu1 %v2907_v56 }
  0x76   :  { %2079 = vmatprep.subr.bf16.mxu1 %v2915_v57 }
  0x77   :  { %1998 = vmatpush1.bf16.msra.mxu0 %v2910_v47 }
  0x79   :  { %2080 = vmatpush1.bf16.msra.mxu1 %v2913_v58 }
  0x7a   :  { %10 = vsyncpa [#allocation3], 0  ;;  %1999 = vmatprep.subr.bf16.mxu0 %v2918_v59  ;;  %2081 = vmatprep.subr.bf16.mxu1 %v2921_v60  ;;  %v2924_v63 = vld [vmem:[%s4182_s3 + $0x34c] ss:$28 sps:$4 sm:$0xff]   ;;  %v2927_v0 = vld [vmem:[%s4182_s3 + $0x354] ss:$28 sps:$4 sm:$0xff]   ;;  %v89_v5 = vlaneseq }
  0x7b   :  { %2000 = vmatpush1.bf16.msra.mxu0 %v2916_v61  ;;  %v2922_v1 = vld [vmem:[%s4182_s3 + $0x348] ss:$28 sps:$4 sm:$0xff]   ;;  %v2925_v2 = vld [vmem:[%s4182_s3 + $0x350] ss:$28 sps:$4 sm:$0xff]   ;;  %v3626_v8 = vld [vmem:[%s4181_s2] sm:$0xf] }
  0x7c   :  { %2001 = vmatprep.subr.bf16.mxu0 %v2924_v63  ;;  %v2930_v3 = vld [vmem:[%s4182_s3 + $0x384] ss:$28 sps:$4 sm:$0xff]   ;;  %v2933_v4 = vld [vmem:[%s4182_s3 + $0x38c] ss:$28 sps:$4 sm:$0xff]   ;;  %v3620_v6 = vshrl.u32 %v89_v5, 7  ;;  %vm2357_vm0 = vcmask 125952  }
  0x7d   :  { %2082 = vmatpush1.bf16.msra.mxu1 %v2919_v62  ;;  %v2928_v21 = vld [vmem:[%s4182_s3 + $0x380] ss:$28 sps:$4 sm:$0xff]   ;;  %v2931_v22 = vld [vmem:[%s4182_s3 + $0x388] ss:$28 sps:$4 sm:$0xff]   ;;  %v2934_v26 = vld [vmem:[%s4182_s3 + $0x3b8] ss:$28 sps:$4 sm:$0xff]  }
  0x7e   :  { %2083 = vmatprep.subr.bf16.mxu1 %v2927_v0  ;;  %v91_v7 = vsub.s32 0, %v3620_v6  ;;  %v95_v9 = vsub.s32 1, %v3620_v6  ;;  %v2936_v24 = vld [vmem:[%s4182_s3 + $0x3bc] ss:$28 sps:$4 sm:$0xff]   ;;  %v2939_v25 = vld [vmem:[%s4182_s3 + $0x3c4] ss:$28 sps:$4 sm:$0xff]  }
  0x7f   :  { %2002 = vmatpush1.bf16.msra.mxu0 %v2922_v1  ;;  %v2937_v27 = vld [vmem:[%s4182_s3 + $0x3c0] ss:$28 sps:$4 sm:$0xff]   ;;  %v2942_v28 = vld [vmem:[%s4182_s3 + $0x3f4] ss:$28 sps:$4 sm:$0xff]   ;;  %v2948_v32 = vld [vmem:[%s4182_s3 + $0x42c] ss:$28 sps:$4 sm:$0xff]  }
  0x80   :  { %2012 = vmatprep.subr.bf16.mxu0 %v2930_v3  ;;  %v92_v10 = vrot.slane %v3626_v8, %v91_v7  ;;  %v96_v11 = vrot.slane %v3626_v8, %v95_v9  ;;  %v2945_v29 = vld [vmem:[%s4182_s3 + $0x3fc] ss:$28 sps:$4 sm:$0xff]   ;;  %v2940_v30 = vld [vmem:[%s4182_s3 + $0x3f0] ss:$28 sps:$4 sm:$0xff]   ;;  %v103_v34 = vsub.s32 3, %v3620_v6 }
  0x81   :  { %2084 = vmatpush1.bf16.msra.mxu1 %v2925_v2  ;;  %v2943_v31 = vld [vmem:[%s4182_s3 + $0x3f8] ss:$28 sps:$4 sm:$0xff]   ;;  %v2946_v35 = vld [vmem:[%s4182_s3 + $0x428] ss:$28 sps:$4 sm:$0xff]   ;;  %v2949_v36 = vld [vmem:[%s4182_s3 + $0x430] ss:$28 sps:$4 sm:$0xff]  }
  0x82   :  { %2094 = vmatprep.subr.bf16.mxu1 %v2933_v4  ;;  %v2951_v33 = vld [vmem:[%s4182_s3 + $0x434] ss:$28 sps:$4 sm:$0xff]   ;;  %v2954_v37 = vld [vmem:[%s4182_s3 + $0x464] ss:$28 sps:$4 sm:$0xff]   ;;  %v2957_v38 = vld [vmem:[%s4182_s3 + $0x46c] ss:$28 sps:$4 sm:$0xff]   ;;  %v104_v39 = vrot.slane %v3626_v8, %v103_v34 }
  0x83   :  { %v2952_v40 = vld [vmem:[%s4182_s3 + $0x460] ss:$28 sps:$4 sm:$0xff]   ;;  %v2955_v41 = vld [vmem:[%s4182_s3 + $0x468] ss:$28 sps:$4 sm:$0xff]   ;;  %v2958_v49 = vld [vmem:[%s4182_s3 + $0x498] ss:$28 sps:$4 sm:$0xff]  }
  0x84   :  { %v2960_v43 = vld [vmem:[%s4182_s3 + $0x49c] ss:$28 sps:$4 sm:$0xff]   ;;  %v2963_v44 = vld [vmem:[%s4182_s3 + $0x4a4] ss:$28 sps:$4 sm:$0xff]   ;;  %v2966_v52 = vld [vmem:[%s4182_s3 + $0x4d4] ss:$28 sps:$4 sm:$0xff]  }
  0x85   :  { %v2961_v50 = vld [vmem:[%s4182_s3 + $0x4a0] ss:$28 sps:$4 sm:$0xff]   ;;  %v2964_v55 = vld [vmem:[%s4182_s3 + $0x4d0] ss:$28 sps:$4 sm:$0xff]   ;;  %v2967_v56 = vld [vmem:[%s4182_s3 + $0x4d8] ss:$28 sps:$4 sm:$0xff]  }
  0x86   :  { %v2969_v53 = vld [vmem:[%s4182_s3 + $0x4dc] ss:$28 sps:$4 sm:$0xff]   ;;  %v2972_v57 = vld [vmem:[%s4182_s3 + $0x50c] ss:$28 sps:$4 sm:$0xff]   ;;  %v2975_v58 = vld [vmem:[%s4182_s3 + $0x514] ss:$28 sps:$4 sm:$0xff]  }
  0x87   :  { %v2970_v59 = vld [vmem:[%s4182_s3 + $0x508] ss:$28 sps:$4 sm:$0xff]   ;;  %v2973_v60 = vld [vmem:[%s4182_s3 + $0x510] ss:$28 sps:$4 sm:$0xff]   ;;  %v2976_v63 = vld [vmem:[%s4182_s3 + $0x540] ss:$28 sps:$4 sm:$0xff]  }
  0x88   :  { %v2978_v61 = vld [vmem:[%s4182_s3 + $0x544] ss:$28 sps:$4 sm:$0xff]   ;;  %v2981_v62 = vld [vmem:[%s4182_s3 + $0x54c] ss:$28 sps:$4 sm:$0xff]   ;;  %v2984_v1 = vld [vmem:[%s4182_s3 + $0x57c] ss:$28 sps:$4 sm:$0xff]  }
  0x89   :  { %v2979_v0 = vld [vmem:[%s4182_s3 + $0x548] ss:$28 sps:$4 sm:$0xff]   ;;  %v2982_v3 = vld [vmem:[%s4182_s3 + $0x578] ss:$28 sps:$4 sm:$0xff]   ;;  %v2985_v4 = vld [vmem:[%s4182_s3 + $0x580] ss:$28 sps:$4 sm:$0xff]  }
  0x8a   :  { %v2987_v2 = vld [vmem:[%s4182_s3 + $0x584] ss:$28 sps:$4 sm:$0xff]   ;;  %v2990_v5 = vld [vmem:[%s4182_s3 + $0x5b4] ss:$28 sps:$4 sm:$0xff]  }
 0x115   :  { %v470_v12 = vpop.f32.mrb[0].mxu0 }
 0x116   :  { %v471_v13 = vadd.f32 %v470_v12, %v92_v10  ;;  %v472_v14 = vpop.f32.mrb[1].mxu0  ;;  %v2993_v10 = vld [vmem:[%s4182_s3 + $0x5bc] ss:$28 sps:$4 sm:$0xff]  }
 0x117   :  { %v473_v15 = vadd.f32 %v472_v14, %v96_v11  ;;  %v474_v16 = vpop.f32.mrb[2].mxu0  ;;  %v3701_v42 = vpop.f32.mrb[0].mxu1  ;;  %v2988_v11 = vld [vmem:[%s4182_s3 + $0x5b0] ss:$28 sps:$4 sm:$0xff]   ;;  %v2991_v12 = vld [vmem:[%s4182_s3 + $0x5b8] ss:$28 sps:$4 sm:$0xff]  }
 0x118   :  { %v518_v17 = vmax.f32 %v471_v13, 0.0  ;;  %v475_v18 = vpop.f32.mrb[3].mxu0  ;;  %v513_v45 = vpop.f32.mrb[1].mxu1  ;;  %v2996_v13 = vld [vmem:[%s4182_s3 + $0x5ec] ss:$28 sps:$4 sm:$0xff]  }
 0x119   :  { %v519_v19 = vmax.f32 %v473_v15, 0.0  ;;  %v514_v46 = vadd.f32 %v513_v45, %v104_v39  ;;  %v515_v47 = vpop.f32.mrb[2].mxu1  ;;  %v2999_v14 = vld [vmem:[%s4182_s3 + $0x5f4] ss:$28 sps:$4 sm:$0xff]   ;;  %v2994_v15 = vld [vmem:[%s4182_s3 + $0x5e8] ss:$28 sps:$4 sm:$0xff]  }
 0x11a   :  { %v3643_v23 = vpack.c.bf16 %v518_v17, %v518_v17  ;;  %v516_v48 = vpop.f32.mrb[3].mxu1  ;;  %v2997_v16 = vld [vmem:[%s4182_s3 + $0x5f0] ss:$28 sps:$4 sm:$0xff]   ;;  %v3002_v17 = vld [vmem:[%s4182_s3 + $0x624] ss:$28 sps:$4 sm:$0xff]  }
 0x11b   :  { %v3635_v20 = vpack.c.bf16 %v519_v19, %v519_v19  ;;  %v521_v51 = vmax.f32 %v514_v46, 0.0  ;;  %v3005_v18 = vld [vmem:[%s4182_s3 + $0x62c] ss:$28 sps:$4 sm:$0xff]   ;;  %v99_v19 = vsub.s32 2, %v3620_v6  ;;  %v3026_v39 = vld [vmem:[%s4182_s3 + $0x14] ss:$28 sps:$4 sm:$0xff]  }
 0x11c   :  { %v3032_v45 = vld [vmem:[%s4182_s3 + $0x210] ss:$28 sps:$4 sm:$0xff]   ;;  %v3029_v46 = vld [vmem:[%s4182_s3 + $0x48] ss:$28 sps:$4 sm:$0xff]  }
 0x11d   :  { %2003 = vmatprep.mubr.bf16.mxu0 %v3635_v20  ;;  %2085 = vmatprep.mubr.bf16.mxu1 %v3635_v20  ;;  %v3721_v54 = vpack.c.bf16 %v521_v51, %v521_v51  ;;  %v3033_v47 = vld [vmem:[%s4182_s3 + $0x50] ss:$28 sps:$4 sm:$0xff]   ;;  %v3036_v48 = vld [vmem:[%s4182_s3 + $0x84] ss:$28 sps:$4 sm:$0xff]   ;;  %v3041_v51 = vld [vmem:[%s4182_s3 + $0xbc] ss:$28 sps:$4 sm:$0xff]  }
 0x11e   :  { %2004 = vmatmul.mubr.bf16.vlgmr.msra.gmra.mrb[4].mxu0 %v3643_v23  ;;  %2086 = vmatmul.mubr.bf16.vlgmr.msra.gmra.mrb[4].mxu1 %v3643_v23 }
 0x11f   :  { %2013 = vmatpush1.bf16.msra.mxu0 %v2928_v21  ;;  %2095 = vmatpush1.bf16.msra.mxu1 %v2931_v22  ;;  %v3000_v21 = vld [vmem:[%s4182_s3 + $0x620] ss:$28 sps:$4 sm:$0xff]   ;;  %v3003_v22 = vld [vmem:[%s4182_s3 + $0x628] ss:$28 sps:$4 sm:$0xff]  }
 0x120   :  { %2014 = vmatprep.subr.bf16.mxu0 %v2936_v24  ;;  %2096 = vmatprep.subr.bf16.mxu1 %v2939_v25  ;;  %v3008_v24 = vld [vmem:[%s4182_s3 + $0x65c] ss:$28 sps:$4 sm:$0xff]   ;;  %v3011_v25 = vld [vmem:[%s4182_s3 + $0x664] ss:$28 sps:$4 sm:$0xff]  }
 0x121   :  { %2044 = vmatprep.mubr.bf16.mxu0 %v3721_v54  ;;  %2126 = vmatprep.mubr.bf16.mxu1 %v3721_v54 }
 0x123   :  { %2015 = vmatpush1.bf16.msra.mxu0 %v2934_v26  ;;  %2097 = vmatpush1.bf16.msra.mxu1 %v2937_v27  ;;  %v100_v26 = vrot.slane %v3626_v8, %v99_v19  ;;  %v3006_v27 = vld [vmem:[%s4182_s3 + $0x658] ss:$28 sps:$4 sm:$0xff]  }
 0x124   :  { %2016 = vmatprep.subr.bf16.mxu0 %v2942_v28  ;;  %2098 = vmatprep.subr.bf16.mxu1 %v2945_v29  ;;  %v3009_v28 = vld [vmem:[%s4182_s3 + $0x660] ss:$28 sps:$4 sm:$0xff]   ;;  %v3014_v29 = vld [vmem:[%s4182_s3 + $0x694] ss:$28 sps:$4 sm:$0xff]  }
 0x125   :  { %v3017_v8 = vld [vmem:[%s4182_s3 + $0x69c] ss:$28 sps:$4 sm:$0xff]  }
 0x127   :  { %2017 = vmatpush1.bf16.msra.mxu0 %v2940_v30  ;;  %2099 = vmatpush1.bf16.msra.mxu1 %v2943_v31  ;;  %v512_v30 = vadd.f32 %v3701_v42, %v100_v26  ;;  %v3012_v31 = vld [vmem:[%s4182_s3 + $0x690] ss:$28 sps:$4 sm:$0xff]   ;;  %v3078_v26 = vld [vmem:[%s4182_s3 + $0x408] ss:$28 sps:$4 sm:$0xff]  }
 0x128   :  { %2018 = vmatprep.subr.bf16.mxu0 %v2948_v32  ;;  %2100 = vmatprep.subr.bf16.mxu1 %v2951_v33  ;;  %v3015_v32 = vld [vmem:[%s4182_s3 + $0x698] ss:$28 sps:$4 sm:$0xff]   ;;  %v3020_v33 = vld [vmem:[%s4182_s3 + $0x6cc] ss:$28 sps:$4 sm:$0xff]  }
 0x129   :  { %v3024_v42 = vld [vmem:[%s4182_s3 + $0x10] ss:$28 sps:$4 sm:$0xff]  }
 0x12b   :  { %2019 = vmatpush1.bf16.msra.mxu0 %v2946_v35  ;;  %2101 = vmatpush1.bf16.msra.mxu1 %v2949_v36  ;;  %v3023_v35 = vld [vmem:[%s4182_s3 + $0x6d4] ss:$28 sps:$4 sm:$0xff]   ;;  %v520_v36 = vmax.f32 %v512_v30, 0.0 }
 0x12c   :  { %2020 = vmatprep.subr.bf16.mxu0 %v2954_v37  ;;  %2102 = vmatprep.subr.bf16.mxu1 %v2957_v38  ;;  %v3018_v37 = vld [vmem:[%s4182_s3 + $0x6c8] ss:$28 sps:$4 sm:$0xff]   ;;  %v3021_v38 = vld [vmem:[%s4182_s3 + $0x6d0] ss:$28 sps:$4 sm:$0xff]  }
 0x12d   :  { %v3086_v30 = vld [vmem:[%s4182_s3 + $0x2b4] ss:$28 sps:$4 sm:$0xff]  }
 0x12f   :  { %2021 = vmatpush1.bf16.msra.mxu0 %v2952_v40  ;;  %2103 = vmatpush1.bf16.msra.mxu1 %v2955_v41  ;;  %v3027_v40 = vld [vmem:[%s4182_s3 + $0x1d8] ss:$28 sps:$4 sm:$0xff]   ;;  %v3850_v41 = vpack.c.bf16 %v520_v36, %v520_v36  ;;  %v3092_v36 = vld [vmem:[%s4182_s3 + $0x670] ss:$28 sps:$4 sm:$0xff]  }
 0x130   :  { %2022 = vmatprep.subr.bf16.mxu0 %v2960_v43  ;;  %2104 = vmatprep.subr.bf16.mxu1 %v2963_v44  ;;  %v3028_v43 = vld [vmem:[%s4182_s3 + $0x18] ss:$28 sps:$4 sm:$0xff]   ;;  %v3031_v44 = vld [vmem:[%s4182_s3 + $0x4c] ss:$28 sps:$4 sm:$0xff]  }
 0x133   :  { %2023 = vmatpush1.bf16.msra.mxu0 %v2958_v49  ;;  %2105 = vmatpush1.bf16.msra.mxu1 %v2961_v50  ;;  %v3037_v49 = vld [vmem:[%s4182_s3 + $0x248] ss:$28 sps:$4 sm:$0xff]   ;;  %v3034_v50 = vld [vmem:[%s4182_s3 + $0x80] ss:$28 sps:$4 sm:$0xff]  }
 0x134   :  { %2024 = vmatprep.subr.bf16.mxu0 %v2966_v52  ;;  %2106 = vmatprep.subr.bf16.mxu1 %v2969_v53  ;;  %v3042_v52 = vld [vmem:[%s4182_s3 + $0x280] ss:$28 sps:$4 sm:$0xff]   ;;  %v3039_v53 = vld [vmem:[%s4182_s3 + $0xb8] ss:$28 sps:$4 sm:$0xff]  }
 0x137   :  { %2025 = vmatpush1.bf16.msra.mxu0 %v2964_v55  ;;  %2107 = vmatpush1.bf16.msra.mxu1 %v2967_v56  ;;  %v3043_v55 = vld [vmem:[%s4182_s3 + $0xc0] ss:$28 sps:$4 sm:$0xff]   ;;  %v3046_v56 = vld [vmem:[%s4182_s3 + $0xf4] ss:$28 sps:$4 sm:$0xff]  }
 0x138   :  { %2026 = vmatprep.subr.bf16.mxu0 %v2972_v57  ;;  %2108 = vmatprep.subr.bf16.mxu1 %v2975_v58  ;;  %v3047_v57 = vld [vmem:[%s4182_s3 + $0x2b8] ss:$28 sps:$4 sm:$0xff]   ;;  %v3044_v58 = vld [vmem:[%s4182_s3 + $0xf0] ss:$28 sps:$4 sm:$0xff]  }
 0x13b   :  { %2027 = vmatpush1.bf16.msra.mxu0 %v2970_v59  ;;  %2109 = vmatpush1.bf16.msra.mxu1 %v2973_v60  ;;  %v3048_v59 = vld [vmem:[%s4182_s3 + $0xf8] ss:$28 sps:$4 sm:$0xff]   ;;  %v3051_v60 = vld [vmem:[%s4182_s3 + $0x12c] ss:$28 sps:$4 sm:$0xff]  }
 0x13c   :  { %2028 = vmatprep.subr.bf16.mxu0 %v2978_v61  ;;  %2110 = vmatprep.subr.bf16.mxu1 %v2981_v62  ;;  %v3052_v61 = vld [vmem:[%s4182_s3 + $0x2f0] ss:$28 sps:$4 sm:$0xff]   ;;  %v3049_v62 = vld [vmem:[%s4182_s3 + $0x128] ss:$28 sps:$4 sm:$0xff]  }
 0x13f   :  { %2029 = vmatpush1.bf16.msra.mxu0 %v2976_v63  ;;  %2111 = vmatpush1.bf16.msra.mxu1 %v2979_v0  ;;  %v3053_v63 = vld [vmem:[%s4182_s3 + $0x130] ss:$28 sps:$4 sm:$0xff]   ;;  %v3056_v0 = vld [vmem:[%s4182_s3 + $0x164] ss:$28 sps:$4 sm:$0xff]  }
 0x140   :  { %2030 = vmatprep.subr.bf16.mxu0 %v2984_v1  ;;  %2112 = vmatprep.subr.bf16.mxu1 %v2987_v2  ;;  %v3057_v1 = vld [vmem:[%s4182_s3 + $0x328] ss:$28 sps:$4 sm:$0xff]   ;;  %v3054_v2 = vld [vmem:[%s4182_s3 + $0x160] ss:$28 sps:$4 sm:$0xff]  }
 0x143   :  { %2031 = vmatpush1.bf16.msra.mxu0 %v2982_v3  ;;  %2113 = vmatpush1.bf16.msra.mxu1 %v2985_v4  ;;  %v3058_v3 = vld [vmem:[%s4182_s3 + $0x168] ss:$28 sps:$4 sm:$0xff]   ;;  %v3061_v4 = vld [vmem:[%s4182_s3 + $0x19c] ss:$28 sps:$4 sm:$0xff]  }
 0x144   :  { %2032 = vmatprep.subr.bf16.mxu0 %v2990_v5  ;;  %2114 = vmatprep.subr.bf16.mxu1 %v2993_v10  ;;  %v3062_v5 = vld [vmem:[%s4182_s3 + $0x360] ss:$28 sps:$4 sm:$0xff]   ;;  %v3059_v10 = vld [vmem:[%s4182_s3 + $0x198] ss:$28 sps:$4 sm:$0xff]  }
 0x147   :  { %2033 = vmatpush1.bf16.msra.mxu0 %v2988_v11  ;;  %2115 = vmatpush1.bf16.msra.mxu1 %v2991_v12  ;;  %v3063_v11 = vld [vmem:[%s4182_s3 + $0x1a0] ss:$28 sps:$4 sm:$0xff]   ;;  %v3066_v12 = vld [vmem:[%s4182_s3 + $0x1d4] ss:$28 sps:$4 sm:$0xff]  }
 0x148   :  { %2034 = vmatprep.subr.bf16.mxu0 %v2996_v13  ;;  %2116 = vmatprep.subr.bf16.mxu1 %v2999_v14  ;;  %v3067_v13 = vld [vmem:[%s4182_s3 + $0x558] ss:$28 sps:$4 sm:$0xff]   ;;  %v3064_v14 = vld [vmem:[%s4182_s3 + $0x1d0] ss:$28 sps:$4 sm:$0xff]  }
 0x14b   :  { %2035 = vmatpush1.bf16.msra.mxu0 %v2994_v15  ;;  %2117 = vmatpush1.bf16.msra.mxu1 %v2997_v16  ;;  %v3068_v15 = vld [vmem:[%s4182_s3 + $0x398] ss:$28 sps:$4 sm:$0xff]   ;;  %v3071_v16 = vld [vmem:[%s4182_s3 + $0x20c] ss:$28 sps:$4 sm:$0xff]  }
 0x14c   :  { %2036 = vmatprep.subr.bf16.mxu0 %v3002_v17  ;;  %2118 = vmatprep.subr.bf16.mxu1 %v3005_v18  ;;  %v3072_v17 = vld [vmem:[%s4182_s3 + $0x590] ss:$28 sps:$4 sm:$0xff]   ;;  %v3069_v18 = vld [vmem:[%s4182_s3 + $0x208] ss:$28 sps:$4 sm:$0xff]  }
 0x14f   :  { %2037 = vmatpush1.bf16.msra.mxu0 %v3000_v21  ;;  %2119 = vmatpush1.bf16.msra.mxu1 %v3003_v22  ;;  %v3073_v21 = vld [vmem:[%s4182_s3 + $0x3d0] ss:$28 sps:$4 sm:$0xff]   ;;  %v3076_v22 = vld [vmem:[%s4182_s3 + $0x244] ss:$28 sps:$4 sm:$0xff]  }
 0x150   :  { %2038 = vmatprep.subr.bf16.mxu0 %v3008_v24  ;;  %2120 = vmatprep.subr.bf16.mxu1 %v3011_v25  ;;  %v3077_v24 = vld [vmem:[%s4182_s3 + $0x5c8] ss:$28 sps:$4 sm:$0xff]   ;;  %v3074_v25 = vld [vmem:[%s4182_s3 + $0x240] ss:$28 sps:$4 sm:$0xff]  }
 0x153   :  { %2039 = vmatpush1.bf16.msra.mxu0 %v3006_v27  ;;  %2121 = vmatpush1.bf16.msra.mxu1 %v3009_v28  ;;  %v3081_v27 = vld [vmem:[%s4182_s3 + $0x27c] ss:$28 sps:$4 sm:$0xff]  }
 0x154   :  { %2040 = vmatprep.subr.bf16.mxu0 %v3014_v29  ;;  %2122 = vmatprep.subr.bf16.mxu1 %v3017_v8  ;;  %v3082_v28 = vld [vmem:[%s4182_s3 + $0x600] ss:$28 sps:$4 sm:$0xff]   ;;  %v3079_v29 = vld [vmem:[%s4182_s3 + $0x278] ss:$28 sps:$4 sm:$0xff]  }
 0x155   :  { %v3083_v8 = vld [vmem:[%s4182_s3 + $0x440] ss:$28 sps:$4 sm:$0xff]  }
 0x157   :  { %2041 = vmatpush1.bf16.msra.mxu0 %v3012_v31  ;;  %2123 = vmatpush1.bf16.msra.mxu1 %v3015_v32  ;;  %v3087_v31 = vld [vmem:[%s4182_s3 + $0x638] ss:$28 sps:$4 sm:$0xff]   ;;  %v3084_v32 = vld [vmem:[%s4182_s3 + $0x2b0] ss:$28 sps:$4 sm:$0xff]  }
 0x158   :  { %2042 = vmatprep.subr.bf16.mxu0 %v3020_v33  ;;  %2124 = vmatprep.subr.bf16.mxu1 %v3023_v35  ;;  %v3088_v33 = vld [vmem:[%s4182_s3 + $0x478] ss:$28 sps:$4 sm:$0xff]   ;;  %v3091_v35 = vld [vmem:[%s4182_s3 + $0x2ec] ss:$28 sps:$4 sm:$0xff]  }
 0x15b   :  { %2043 = vmatpush1.bf16.msra.mxu0 %v3018_v37  ;;  %2125 = vmatpush1.bf16.msra.mxu1 %v3021_v38  ;;  %v3089_v37 = vld [vmem:[%s4182_s3 + $0x2e8] ss:$28 sps:$4 sm:$0xff]   ;;  %v3093_v38 = vld [vmem:[%s4182_s3 + $0x4b0] ss:$28 sps:$4 sm:$0xff]  }
 0x15c   :  { %2135 = vmatprep.subr.bf16.mxu0 %v3026_v39  ;;  %2671 = vmatprep.subr.bf16.mxu1 %v3027_v40  ;;  %v3096_v39 = vld [vmem:[%s4182_s3 + $0x324] ss:$28 sps:$4 sm:$0xff]  }
 0x15d   :  { %v3097_v40 = vld [vmem:[%s4182_s3 + $0x6a8] ss:$28 sps:$4 sm:$0xff]  }
 0x15e   :  { %2045 = vmatmul.mubr.bf16.vlgmr.msra.gmra.mrb[4].mxu0 %v3850_v41  ;;  %2127 = vmatmul.mubr.bf16.vlgmr.msra.gmra.mrb[4].mxu1 %v3850_v41 }
 0x15f   :  { %2136 = vmatpush1.bf16.msra.mxu0 %v3024_v42  ;;  %2167 = vmatprep.mubr.bf16.mxu0 %v3635_v20  ;;  %v3094_v42 = vld [vmem:[%s4182_s3 + $0x320] ss:$28 sps:$4 sm:$0xff]  }
 0x160   :  { %2672 = vmatpush3.bf16.msra.mxu1 %v3028_v43  ;;  %2249 = vmatprep.mubr.bf16.mxu1 %v3635_v20  ;;  %v3038_v20 = vld [vmem:[%s4182_s3 + $0x88] ss:$28 sps:$4 sm:$0xff]  }
 0x161   :  { %2137 = vmatprep.subr.bf16.mxu0 %v3031_v44  ;;  %2673 = vmatprep.subr.bf16.mxu1 %v3032_v45  ;;  %v3098_v43 = vld [vmem:[%s4182_s3 + $0x4e8] ss:$28 sps:$4 sm:$0xff]   ;;  %v3101_v44 = vld [vmem:[%s4182_s3 + $0x35c] ss:$28 sps:$4 sm:$0xff]  }
 0x162   :  { %v3102_v45 = vld [vmem:[%s4182_s3 + $0x6e0] ss:$28 sps:$4 sm:$0xff]  }
 0x163   :  { %2138 = vmatpush1.bf16.msra.mxu0 %v3029_v46  ;;  %v3099_v46 = vld [vmem:[%s4182_s3 + $0x358] ss:$28 sps:$4 sm:$0xff]  }
 0x164   :  { %2674 = vmatpush3.bf16.msra.mxu1 %v3033_v47  ;;  %2139 = vmatprep.subr.bf16.mxu0 %v3036_v48  ;;  %v3103_v47 = vld [vmem:[%s4182_s3 + $0x520] ss:$28 sps:$4 sm:$0xff]   ;;  %v3106_v48 = vld [vmem:[%s4182_s3 + $0x394] ss:$28 sps:$4 sm:$0xff]  }
 0x165   :  { %2675 = vmatprep.subr.bf16.mxu1 %v3037_v49  ;;  %v3104_v49 = vld [vmem:[%s4182_s3 + $0x390] ss:$28 sps:$4 sm:$0xff]  }
 0x167   :  { %2140 = vmatpush1.bf16.msra.mxu0 %v3034_v50  ;;  %v3109_v50 = vld [vmem:[%s4182_s3 + $0x3cc] ss:$28 sps:$4 sm:$0xff]  }
 0x168   :  { %2676 = vmatpush3.bf16.msra.mxu1 %v3038_v20  ;;  %2141 = vmatprep.subr.bf16.mxu0 %v3041_v51  ;;  %v3107_v20 = vld [vmem:[%s4182_s3 + $0x3c8] ss:$28 sps:$4 sm:$0xff]  }
 0x169   :  { %2677 = vmatprep.subr.bf16.mxu1 %v3042_v52  ;;  %v3112_v51 = vld [vmem:[%s4182_s3 + $0x404] ss:$28 sps:$4 sm:$0xff]  }
 0x16a   :  { %v3110_v52 = vld [vmem:[%s4182_s3 + $0x400] ss:$28 sps:$4 sm:$0xff]  }
 0x16b   :  { %2142 = vmatpush1.bf16.msra.mxu0 %v3039_v53  ;;  %v3118_v53 = vld [vmem:[%s4182_s3 + $0x474] ss:$28 sps:$4 sm:$0xff]  }
 0x16c   :  { %2678 = vmatpush3.bf16.msra.mxu1 %v3043_v55  ;;  %2143 = vmatprep.subr.bf16.mxu0 %v3046_v56  ;;  %v3116_v55 = vld [vmem:[%s4182_s3 + $0x470] ss:$28 sps:$4 sm:$0xff]  }
 0x16d   :  { %2679 = vmatprep.subr.bf16.mxu1 %v3047_v57  ;;  %v3121_v56 = vld [vmem:[%s4182_s3 + $0x4ac] ss:$28 sps:$4 sm:$0xff]  }
 0x16e   :  { %v3119_v57 = vld [vmem:[%s4182_s3 + $0x4a8] ss:$28 sps:$4 sm:$0xff]  }
 0x16f   :  { %2144 = vmatpush1.bf16.msra.mxu0 %v3044_v58  ;;  %v3124_v58 = vld [vmem:[%s4182_s3 + $0x4e4] ss:$28 sps:$4 sm:$0xff]  }
 0x170   :  { %2680 = vmatpush3.bf16.msra.mxu1 %v3048_v59  ;;  %2145 = vmatprep.subr.bf16.mxu0 %v3051_v60  ;;  %v3122_v59 = vld [vmem:[%s4182_s3 + $0x4e0] ss:$28 sps:$4 sm:$0xff]  }
 0x171   :  { %2681 = vmatprep.subr.bf16.mxu1 %v3052_v61  ;;  %v3127_v60 = vld [vmem:[%s4182_s3 + $0x51c] ss:$28 sps:$4 sm:$0xff]  }
 0x172   :  { %v3125_v61 = vld [vmem:[%s4182_s3 + $0x518] ss:$28 sps:$4 sm:$0xff]  }
 0x173   :  { %2146 = vmatpush1.bf16.msra.mxu0 %v3049_v62  ;;  %v3130_v62 = vld [vmem:[%s4182_s3 + $0x554] ss:$28 sps:$4 sm:$0xff]  }
 0x174   :  { %2682 = vmatpush3.bf16.msra.mxu1 %v3053_v63  ;;  %2147 = vmatprep.subr.bf16.mxu0 %v3056_v0  ;;  %v3128_v63 = vld [vmem:[%s4182_s3 + $0x550] ss:$28 sps:$4 sm:$0xff]  }
 0x175   :  { %2683 = vmatprep.subr.bf16.mxu1 %v3057_v1  ;;  %v3133_v0 = vld [vmem:[%s4182_s3 + $0x58c] ss:$28 sps:$4 sm:$0xff]  }
 0x176   :  { %v3131_v1 = vld [vmem:[%s4182_s3 + $0x588] ss:$28 sps:$4 sm:$0xff]  }
 0x177   :  { %2148 = vmatpush1.bf16.msra.mxu0 %v3054_v2  ;;  %v3136_v2 = vld [vmem:[%s4182_s3 + $0x5c4] ss:$28 sps:$4 sm:$0xff]  }
 0x178   :  { %2684 = vmatpush3.bf16.msra.mxu1 %v3058_v3  ;;  %2149 = vmatprep.subr.bf16.mxu0 %v3061_v4  ;;  %v3134_v3 = vld [vmem:[%s4182_s3 + $0x5c0] ss:$28 sps:$4 sm:$0xff]  }
 0x179   :  { %2685 = vmatprep.subr.bf16.mxu1 %v3062_v5  ;;  %v3139_v4 = vld [vmem:[%s4182_s3 + $0x5fc] ss:$28 sps:$4 sm:$0xff]  }
 0x17a   :  { %v3137_v5 = vld [vmem:[%s4182_s3 + $0x5f8] ss:$28 sps:$4 sm:$0xff]  }
 0x17b   :  { %2150 = vmatpush1.bf16.msra.mxu0 %v3059_v10  ;;  %v3142_v10 = vld [vmem:[%s4182_s3 + $0x634] ss:$28 sps:$4 sm:$0xff]  }
 0x17c   :  { %2686 = vmatpush3.bf16.msra.mxu1 %v3063_v11  ;;  %2151 = vmatprep.subr.bf16.mxu0 %v3066_v12  ;;  %v3140_v11 = vld [vmem:[%s4182_s3 + $0x630] ss:$28 sps:$4 sm:$0xff]  }
 0x17d   :  { %2693 = vmatprep.subr.bf16.mxu1 %v3067_v13  ;;  %v3145_v12 = vld [vmem:[%s4182_s3 + $0x66c] ss:$28 sps:$4 sm:$0xff]  }
 0x17e   :  { %v3143_v13 = vld [vmem:[%s4182_s3 + $0x668] ss:$28 sps:$4 sm:$0xff]  }
 0x17f   :  { %2250 = vmatmul.mubr.bf16.vlgmr.msra.gmra.mrb[8].mxu1 %v3643_v23  ;;  %2152 = vmatpush1.bf16.msra.mxu0 %v3064_v14  ;;  %v3148_v14 = vld [vmem:[%s4182_s3 + $0x6a4] ss:$28 sps:$4 sm:$0xff]  }
 0x180   :  { %2694 = vmatpush3.bf16.msra.mxu1 %v3068_v15  ;;  %2289 = vmatprep.mubr.bf16.mxu1 %v3721_v54  ;;  %v3146_v15 = vld [vmem:[%s4182_s3 + $0x6a0] ss:$28 sps:$4 sm:$0xff]  }
 0x181   :  { %2153 = vmatprep.subr.bf16.mxu0 %v3071_v16  ;;  %2695 = vmatprep.subr.bf16.mxu1 %v3072_v17  ;;  %v3151_v16 = vld [vmem:[%s4182_s3 + $0x6dc] ss:$28 sps:$4 sm:$0xff]  }
 0x182   :  { %v3149_v17 = vld [vmem:[%s4182_s3 + $0x6d8] ss:$28 sps:$4 sm:$0xff]  }
 0x183   :  { %2154 = vmatpush1.bf16.msra.mxu0 %v3069_v18  ;;  %v4147_v18 = vld [vmem:[%s4183_s4] sm:$0x7f] }
 0x184   :  { %2696 = vmatpush3.bf16.msra.mxu1 %v3073_v21  ;;  %2155 = vmatprep.subr.bf16.mxu0 %v3076_v22  ;;  %v787_v21 = vrot.slane %v4147_v18, %v91_v7  ;;  %v795_v22 = vrot.slane %v4147_v18, %v99_v19 }
 0x185   :  { %2697 = vmatprep.subr.bf16.mxu1 %v3077_v24  ;;  %v791_v24 = vrot.slane %v4147_v18, %v95_v9 }
 0x187   :  { %2156 = vmatpush1.bf16.msra.mxu0 %v3074_v25 }
 0x188   :  { %2698 = vmatpush3.bf16.msra.mxu1 %v3078_v26  ;;  %2157 = vmatprep.subr.bf16.mxu0 %v3081_v27 }
 0x189   :  { %2699 = vmatprep.subr.bf16.mxu1 %v3082_v28 }
 0x18b   :  { %2158 = vmatpush1.bf16.msra.mxu0 %v3079_v29 }
 0x18c   :  { %2700 = vmatpush3.bf16.msra.mxu1 %v3083_v8  ;;  %2159 = vmatprep.subr.bf16.mxu0 %v3086_v30 }
 0x18d   :  { %2701 = vmatprep.subr.bf16.mxu1 %v3087_v31 }
 0x18f   :  { %2160 = vmatpush1.bf16.msra.mxu0 %v3084_v32 }
 0x190   :  { %2702 = vmatpush3.bf16.msra.mxu1 %v3088_v33  ;;  %2161 = vmatprep.subr.bf16.mxu0 %v3091_v35 }
 0x191   :  { %2703 = vmatprep.subr.bf16.mxu1 %v3092_v36 }
 0x193   :  { %2162 = vmatpush1.bf16.msra.mxu0 %v3089_v37 }
 0x194   :  { %2704 = vmatpush3.bf16.msra.mxu1 %v3093_v38  ;;  %2163 = vmatprep.subr.bf16.mxu0 %v3096_v39 }
 0x195   :  { %2705 = vmatprep.subr.bf16.mxu1 %v3097_v40 }
 0x197   :  { %2164 = vmatpush1.bf16.msra.mxu0 %v3094_v42 }
 0x198   :  { %2706 = vmatpush3.bf16.msra.mxu1 %v3098_v43  ;;  %2165 = vmatprep.subr.bf16.mxu0 %v3101_v44 }
 0x199   :  { %2707 = vmatprep.subr.bf16.mxu1 %v3102_v45 }
 0x19b   :  { %2166 = vmatpush1.bf16.msra.mxu0 %v3099_v46 }
 0x19c   :  { %2708 = vmatpush3.bf16.msra.mxu1 %v3103_v47  ;;  %2176 = vmatprep.subr.bf16.mxu0 %v3106_v48 }
 0x19e   :  { %2168 = vmatmul.mubr.bf16.vlgmr.msra.gmra.mrb[8].mxu0 %v3643_v23  ;;  %v3115_v23 = vld [vmem:[%s4182_s3 + $0x43c] ss:$28 sps:$4 sm:$0xff]  }
 0x19f   :  { %2290 = vmatmul.mubr.bf16.vlgmr.msra.gmra.mrb[12].mxu1 %v3850_v41  ;;  %2177 = vmatpush1.bf16.msra.mxu0 %v3104_v49 }
 0x1a0   :  { %2208 = vmatprep.mubr.bf16.mxu0 %v3721_v54  ;;  %2178 = vmatprep.subr.bf16.mxu0 %v3109_v50  ;;  %v3113_v54 = vld [vmem:[%s4182_s3 + $0x438] ss:$28 sps:$4 sm:$0xff]   ;;  %s3190_s3 = smov [#allocation2]  }
 0x1a1   :  { %s2365_s4 = sshll.u32 %s3190_s3, 4  ;;  %s2366_s4 = int_to_ptr.vmem [resolvable:$true] %s2365_s4 }
 0x1a2   :  { %s3166_s27 = scalar_lea.vmem %s2366_s4, 448  ;;  %p3171_p1 = scmp.lt.s32.totalorder %s2366_s4, %s2366_s4 }
 0x1a3   :  { %2179 = vmatpush1.bf16.msra.mxu0 %v3107_v20  ;;  %p3167_p0 = scmp.ne.s32.totalorder %s2366_s4, %s3166_s27  ;;  %p3172_p2 = scmp.lt.s32.totalorder %s3166_s27, %s3166_s27 }
 0x1a4   :  { %2180 = vmatprep.subr.bf16.mxu0 %v3112_v51 }
 0x1a5   :  { %p3173_p3 = por %p3172_p2, %p3171_p1 }
 0x1a7   :  { %2181 = vmatpush1.bf16.msra.mxu0 %v3110_v52  ;;  %p3174_p4 = pnand %p3173_p3, %p3167_p0 }
 0x1a8   :  { %2182 = vmatprep.subr.bf16.mxu0 %v3115_v23 }
 0x1ab   :  { %2183 = vmatpush1.bf16.msra.mxu0 %v3113_v54 }
 0x1ac   :  { %2184 = vmatprep.subr.bf16.mxu0 %v3118_v53 }
 0x1af   :  { %2185 = vmatpush1.bf16.msra.mxu0 %v3116_v55  ;;  %v810_v55 = vsub.s32 6, %v3620_v6 }
 0x1b0   :  { %2186 = vmatprep.subr.bf16.mxu0 %v3121_v56 }
 0x1b1   :  { %v811_v56 = vrot.slane %v4147_v18, %v810_v55 }
 0x1b3   :  { %2187 = vmatpush1.bf16.msra.mxu0 %v3119_v57 }
 0x1b4   :  { %2188 = vmatprep.subr.bf16.mxu0 %v3124_v58 }
 0x1b7   :  { %2189 = vmatpush1.bf16.msra.mxu0 %v3122_v59 }
 0x1b8   :  { %2190 = vmatprep.subr.bf16.mxu0 %v3127_v60 }
 0x1bb   :  { %2191 = vmatpush1.bf16.msra.mxu0 %v3125_v61 }
 0x1bc   :  { %2192 = vmatprep.subr.bf16.mxu0 %v3130_v62 }
 0x1bf   :  { %2193 = vmatpush1.bf16.msra.mxu0 %v3128_v63 }
 0x1c0   :  { %2194 = vmatprep.subr.bf16.mxu0 %v3133_v0 }
 0x1c3   :  { %2195 = vmatpush1.bf16.msra.mxu0 %v3131_v1 }
 0x1c4   :  { %2196 = vmatprep.subr.bf16.mxu0 %v3136_v2 }
 0x1c7   :  { %2197 = vmatpush1.bf16.msra.mxu0 %v3134_v3 }
 0x1c8   :  { %2198 = vmatprep.subr.bf16.mxu0 %v3139_v4 }
 0x1cb   :  { %2199 = vmatpush1.bf16.msra.mxu0 %v3137_v5  ;;  %v802_v5 = vsub.s32 4, %v3620_v6 }
 0x1cc   :  { %2200 = vmatprep.subr.bf16.mxu0 %v3142_v10  ;;  %v806_v10 = vsub.s32 5, %v3620_v6 }
 0x1cf   :  { %2201 = vmatpush1.bf16.msra.mxu0 %v3140_v11  ;;  %v803_v11 = vrot.slane %v4147_v18, %v802_v5 }
 0x1d0   :  { %2202 = vmatprep.subr.bf16.mxu0 %v3145_v12  ;;  %v807_v12 = vrot.slane %v4147_v18, %v806_v10 }
 0x1d3   :  { %2203 = vmatpush1.bf16.msra.mxu0 %v3143_v13 }
 0x1d4   :  { %2204 = vmatprep.subr.bf16.mxu0 %v3148_v14 }
 0x1d7   :  { %2205 = vmatpush1.bf16.msra.mxu0 %v3146_v15 }
 0x1d8   :  { %2206 = vmatprep.subr.bf16.mxu0 %v3151_v16 }
 0x1db   :  { %2207 = vmatpush1.bf16.msra.mxu0 %v3149_v17 }
 0x1de   :  { %2209 = vmatmul.mubr.bf16.vlgmr.msra.gmra.mrb[8].mxu0 %v3850_v41  ;;  %v799_v41 = vrot.slane %v4147_v18, %v103_v34 }
 0x231   :  { %v2046_v25 = vpop.f32.mrb[4].mxu0  ;;  %v2128_v26 = vpop.f32.mrb[4].mxu1 }
 0x232   :  { %v2715_v27 = vadd.f32 %v2046_v25, %v787_v21  ;;  %v2717_v28 = vadd.f32 %v2128_v26, %v795_v22  ;;  %v2048_v29 = vpop.f32.mrb[5].mxu0  ;;  %v2130_v8 = vpop.f32.mrb[5].mxu1 }
 0x233   :  { %v2716_v30 = vadd.f32 %v2048_v29, %v791_v24  ;;  %v2718_v7 = vadd.f32 %v2130_v8, %v799_v41  ;;  %v2050_v31 = vpop.f32.mrb[6].mxu0  ;;  %v2132_v32 = vpop.f32.mrb[6].mxu1 }
 0x234   :  { %v2297_v33 = vmul.f32 0.5, %v2715_v27  ;;  %v2299_v19 = vmul.f32 0.5, %v2717_v28  ;;  %v2051_v35 = vpop.f32.mrb[7].mxu0  ;;  %v2133_v36 = vpop.f32.mrb[7].mxu1 }
 0x235   :  { %v2298_v37 = vmul.f32 0.5, %v2716_v30  ;;  %v2300_v9 = vmul.f32 0.5, %v2718_v7 }
 0x236   :  { %3152 = vtanh.f32 %v2297_v33 }
 0x237   :  { %3154 = vtanh.f32 %v2299_v19 }
 0x238   :  { %3156 = vtanh.f32 %v2298_v37 }
 0x239   :  { %3158 = vtanh.f32 %v2300_v9 }
 0x240   :  { %v3153_v34 = vpop.eup %3152 }
 0x241   :  { %v3155_v38 = vpop.eup %3154  ;;  %v2311_v39 = vmul.f32 0.5, %v3153_v34 }
 0x242   :  { %v3157_v40 = vpop.eup %3156  ;;  %v2313_v42 = vmul.f32 0.5, %v3155_v38 }
 0x243   :  { %v3159_v43 = vpop.eup %3158  ;;  %v2318_v44 = vadd.f32 0.5, %v2311_v39  ;;  %v2312_v45 = vmul.f32 0.5, %v3157_v40 }
 0x244   :  { %v2320_v46 = vadd.f32 0.5, %v2313_v42  ;;  %v2314_v47 = vmul.f32 0.5, %v3159_v43 }
 0x245   :  { %v2319_v48 = vadd.f32 0.5, %v2312_v45 }
 0x246   :  { %v2321_v49 = vadd.f32 0.5, %v2314_v47 }
 0x247   :  { %v2667_v50 = vpack.c.bf16 %v2319_v48, %v2318_v44 }
 0x248   :  { %v2668_v20 = vpack.c.bf16 %v2321_v49, %v2320_v46 }
 0x249   :  { %2354 = vst [vmem:[#allocation2] sm:$0xff] %v2667_v50 }
 0x24a   :  { %2355 = vst [vmem:[#allocation2 + $0x8] sm:$0xff] %v2668_v20 }
 0x252   :  { %v2687_v51 = vpop.f32.mrb[8].mxu1 }
 0x253   :  { %v2688_v52 = vpop.f32.mrb[9].mxu1 }
 0x254   :  { %v2689_v23 = vadd.f32 %v2688_v52, %v2687_v51  ;;  %v2690_v54 = vpop.f32.mrb[10].mxu1 }
 0x255   :  { %v2691_v53 = vpop.f32.mrb[11].mxu1 }
 0x256   :  { %v2252_v59 = vadd.f32 %v2689_v23, %v811_v56 }
 0x272   :  { %v2709_v57 = vpop.f32.mrb[12].mxu1 }
 0x273   :  { %v2710_v58 = vpop.f32.mrb[13].mxu1 }
 0x274   :  { %v2711_v60 = vadd.f32 %v2710_v58, %v2709_v57  ;;  %v2712_v61 = vpop.f32.mrb[14].mxu1 }
 0x275   :  { %v2713_v62 = vpop.f32.mrb[15].mxu1 }
 0x276   :  { %v2292_v63 = vadd.f32 %v2711_v60, %v2252_v59 }
 0x278   :  { %v2303_v0 = vmul.f32 0.5, %v2292_v63 }
 0x27a   :  { %3160 = vtanh.f32 %v2303_v0 }
 0x284   :  { %v3161_v1 = vpop.eup %3160 }
 0x285   :  { %v2317_v2 = vmul.f32 0.5, %v3161_v1 }
 0x287   :  { %v2324_v3 = vadd.f32 0.5, %v2317_v2 }
 0x289   :  { %v2670_v4 = vpack.c.bf16 %v2324_v3, %v2324_v3 }
 0x28b   :  { %2358 = vst.msk [vmem:[#allocation2 + $0x18] sm:$0xf] %vm2357_vm0, %v2670_v4 }
 0x2b1   :  { %v2210_v13 = vpop.f32.mrb[8].mxu0 }
 0x2b2   :  { %v2719_v14 = vadd.f32 %v2210_v13, %v803_v11  ;;  %v2212_v15 = vpop.f32.mrb[9].mxu0 }
 0x2b3   :  { %v2720_v16 = vadd.f32 %v2212_v15, %v807_v12  ;;  %v2214_v17 = vpop.f32.mrb[10].mxu0 }
 0x2b4   :  { %v2301_v21 = vmul.f32 0.5, %v2719_v14  ;;  %v2215_v22 = vpop.f32.mrb[11].mxu0 }
 0x2b5   :  { %v2302_v24 = vmul.f32 0.5, %v2720_v16 }
 0x2b6   :  { %3162 = vtanh.f32 %v2301_v21 }
 0x2b7   :  { %3164 = vtanh.f32 %v2302_v24 }
 0x2c0   :  { %v3163_v41 = vpop.eup %3162 }
 0x2c1   :  { %v3165_v25 = vpop.eup %3164  ;;  %v2315_v26 = vmul.f32 0.5, %v3163_v41 }
 0x2c2   :  { %v2316_v27 = vmul.f32 0.5, %v3165_v25 }
 0x2c3   :  { %v2322_v28 = vadd.f32 0.5, %v2315_v26 }
 0x2c4   :  { %v2323_v6 = vadd.f32 0.5, %v2316_v27 }
 0x2c6   :  { %v2669_v29 = vpack.c.bf16 %v2323_v6, %v2322_v28 }
 0x2c8   :  { %2356 = vst [vmem:[#allocation2 + $0x10] sm:$0xff] %v2669_v29 }
 0x2c9   :  { %3177 = shalt.err (!%p3174_p4)
}
 0x2ca   :  { %s3178_s30 = scalar_lea.hbm %s4184_s5, 448 }
 0x2cb   :  { %p3179_p5 = scmp.ne.s32.totalorder %s4184_s5, %s3178_s30  ;;  %p3182_p6 = scmp.lt.u32.totalorder %s3178_s30, %s4184_s5 }
 0x2cd   :  { %p3184_p7 = pnand %p3182_p6, %p3179_p5 }
 0x2cf   :  { %3187 = shalt.err (!%p3184_p7)
}
 0x2d0   :  { %2368 = dma.vmem_to_hbm [thread:$0]  %s2366_s4, 448, %s4184_s5, [#allocation3]  }
 0x2d1   :  { %3188 = dma.done.wait [#allocation3], 448  }
 0x2d2   :  { %3189 = vsyncadd [#allocation3], 4294966848 }
 0x2d3   :  { %2372 = vsyncpa [#allocation3], 1 }

</bundles_post_ra>
